<compile_context>
chip_gen: v5e
topology: v5e:2x2
jax: 0.10.0
libtpu: 0.0.40
codegen_flags: <defaults>
</compile_context>

<pallas_src>
import functools

import jax
import jax.numpy as jnp
from jax.experimental import pallas as pl
from jax.experimental.pallas import tpu as pltpu

_LANES = 128
_SUBLANES = 8


def _fold_rows(a, acc_r):
    """Reduce an (S, 128) tile to (acc_r, 128) with pure VALU adds.

    The reshape (S,128) -> (S//acc_r, acc_r, 128) is a free relayout (same
    physical vreg layout), and the axis-0 sum is a short chain of dense vreg
    adds — no XLU involved.
    """
    s = a.shape[0]
    if s == acc_r:
        return a
    return jnp.sum(a.reshape(s // acc_r, acc_r, a.shape[1]), axis=0)


def _psp_ce_kernel(*refs, n_preds, ignore_label, g, s_tile, acc_r):
    """One grid step over a (C, S, 128) logits block per prediction.

    Accumulates, per batch item n (grid axis 0, parallel):
      sum_refs[p] += per-lane partial sums of CE loss for prediction p
      cnt_ref     += per-lane partial counts of valid (non-ignored) pixels
    Grid axis 1 (arbitrary) walks pixel tiles; outputs are revisited accumulators.
    """
    tgt_ref = refs[0]
    pred_refs = refs[1:1 + n_preds]
    sum_refs = refs[1 + n_preds:1 + 2 * n_preds]
    cnt_ref = refs[1 + 2 * n_preds]

    i = pl.program_id(1)  # pixel-tile index (reduction axis)

    @pl.when(i == 0)
    def _():
        for s_ref in sum_refs:
            s_ref[...] = jnp.zeros_like(s_ref)
        cnt_ref[...] = jnp.zeros_like(cnt_ref)

    t = tgt_ref[0]                                             # (S, 128) int32
    # Mask the (possibly ragged) last tile along the sublane/pixel-row axis.
    row = jax.lax.broadcasted_iota(jnp.int32, t.shape, 0)      # (S, 128)
    in_bounds = (i * s_tile + row) < g
    valid = (t != ignore_label) & in_bounds                    # (S, 128) bool

    cnt_ref[...] += _fold_rows(valid.astype(jnp.float32), acc_r)[None]

    # Target one-hot mask, shared by both predictions (computed once).
    onehot = None

    for p_ref, s_ref in zip(pred_refs, sum_refs):
        x = p_ref[0]                                           # (C, S, 128)
        if x.dtype != jnp.float32:                             # no-op for f32 inputs
            x = x.astype(jnp.float32)
        if onehot is None:
            cls = jax.lax.broadcasted_iota(jnp.int32, x.shape, 0)
            onehot = cls == t[None]                            # (C, S, 128) bool
        # Numerically-stable log-sum-exp over the class (major) axis: VALU-only
        # reductions over dense (S,128) slabs, exps on the EUP.
        m = jnp.max(x, axis=0)                                 # (S, 128)
        lse = jnp.log(jnp.sum(jnp.exp(x - m[None]), axis=0)) + m
        logit_t = jnp.sum(jnp.where(onehot, x, 0.0), axis=0)   # (S, 128)
        loss_px = jnp.where(valid, lse - logit_t, 0.0)         # (S, 128)
        s_ref[...] += _fold_rows(loss_px, acc_r)[None]


def _pick_sublane_tile(g, c, n_preds, itemsize):
    """Largest sublane tile S (multiple of 8, or full G) fitting the VMEM budget.

    Keeps the *single-buffer* footprint of all prediction blocks <= 6 MiB so
    that double buffering plus elementwise intermediates plus the target stream
    stays well under a 32 MiB scoped-VMEM limit (safe on v5e/v6e/v7x).
    """
    budget = 6 * 1024 * 1024
    s_max = budget // (max(n_preds, 1) * c * _LANES * itemsize)
    s_max = max(_SUBLANES, (s_max // _SUBLANES) * _SUBLANES)
    if g <= s_max:
        return g                      # one tile covers all pixel rows (full-dim block is legal)
    return s_max


def _psp_ce_means(preds, target, *, ignore_label):
    """nn.CrossEntropyLoss(ignore_index=...) 'mean' semantics for each prediction,
    fused into one pallas_call that reads the target tensor once."""
    n, c, h, w = preds[0].shape
    hw = h * w
    n_preds = len(preds)
    itemsize = jnp.dtype(preds[0].dtype).itemsize

    g = pl.cdiv(hw, _LANES)
    hw_pad = g * _LANES
    pad = hw_pad - hw

    # Free reshapes (no transpose): NCHW -> (N, C, H*W) and (N, H*W).
    preds3 = [p.reshape(n, c, hw) for p in preds]
    tgt2 = target.reshape(n, hw).astype(jnp.int32)
    if pad:
        # Rare case (H*W not 128-aligned): one extra HBM pass to align the
        # pixel axis.  Padded targets get ignore_label so they never count.
        preds3 = [jnp.pad(p, ((0, 0), (0, 0), (0, pad))) for p in preds3]
        tgt2 = jnp.pad(tgt2, ((0, 0), (0, pad)), constant_values=ignore_label)
    preds4 = [p.reshape(n, c, g, _LANES) for p in preds3]
    tgt3 = tgt2.reshape(n, g, _LANES)

    s_tile = _pick_sublane_tile(g, c, n_preds, itemsize)
    n_tiles = pl.cdiv(g, s_tile)
    acc_r = _SUBLANES if s_tile % _SUBLANES == 0 else s_tile

    kernel = functools.partial(
        _psp_ce_kernel, n_preds=n_preds, ignore_label=ignore_label,
        g=g, s_tile=s_tile, acc_r=acc_r)

    pred_spec = pl.BlockSpec((1, c, s_tile, _LANES), lambda nn, ii: (nn, 0, ii, 0))
    tgt_spec = pl.BlockSpec((1, s_tile, _LANES), lambda nn, ii: (nn, ii, 0))
    acc_spec = pl.BlockSpec((1, acc_r, _LANES), lambda nn, ii: (nn, 0, 0))

    cost = pl.CostEstimate(
        flops=n_preds * n * hw * (7 * c + 8),
        transcendentals=n_preds * n * hw * (c + 1),
        bytes_accessed=(n_preds * n * c * hw_pad * itemsize
                        + n * hw_pad * 4
                        + (n_preds + 1) * n * acc_r * _LANES * 4),
    )

    outs = pl.pallas_call(
        kernel,
        out_shape=tuple(jax.ShapeDtypeStruct((n, acc_r, _LANES), jnp.float32)
                        for _ in range(n_preds + 1)),
        grid_spec=pltpu.PrefetchScalarGridSpec(
            num_scalar_prefetch=0,
            grid=(n, n_tiles),
            in_specs=[tgt_spec] + [pred_spec] * n_preds,
            out_specs=tuple(acc_spec for _ in range(n_preds + 1)),
        ),
        compiler_params=pltpu.CompilerParams(
            # batch axis -> megacore-parallel on v7x (per-n accumulator blocks,
            # no race); pixel-tile axis -> sequential reduction.
            dimension_semantics=("parallel", "arbitrary"),
            vmem_limit_bytes=32 * 1024 * 1024,
        ),
        cost_estimate=cost,
    )(tgt3, *preds4)

    loss_sums, cnt = outs[:n_preds], outs[n_preds]
    total_cnt = jnp.sum(cnt)  # 0 valid pixels -> NaN, matching PyTorch 'mean'
    return [jnp.sum(s) / total_cnt for s in loss_sums]


def psp_loss(outputs, targets, *, aux_weight, ignore_label):
    """PSPLoss.forward: outputs may be a tuple (main, aux) or a single tensor."""
    if isinstance(outputs, tuple):
        main_loss, aux_loss = _psp_ce_means(
            [outputs[0], outputs[1]], targets, ignore_label=ignore_label)
        return main_loss + aux_weight * aux_loss
    (loss,) = _psp_ce_means([outputs], targets, ignore_label=ignore_label)
    return loss


if __name__ == "__main__":
    # cfg constants (deterministic, in-script)
    AUX_WEIGHT = 0.4
    IGNORE_LABEL = 255

    key = jax.random.PRNGKey(0)
    k1, k2, k3, k4 = jax.random.split(key, 4)

    N, C, H, W = 2, 4, 16, 16
    main_pred = jax.random.normal(k1, (N, C, H, W), dtype=jnp.float32)
    aux_pred = jax.random.normal(k2, (N, C, H, W), dtype=jnp.float32)

    targets = jax.random.randint(k3, (N, H, W), 0, C, dtype=jnp.int32)
    # sprinkle some ignore_label pixels
    ignore_mask = jax.random.bernoulli(k4, p=0.2, shape=(N, H, W))
    targets = jnp.where(ignore_mask, IGNORE_LABEL, targets)

    loss = psp_loss((main_pred, aux_pred), targets,
                    aux_weight=AUX_WEIGHT, ignore_label=IGNORE_LABEL)
    loss = jax.block_until_ready(loss)

    # quick sanity check against pure-JAX reference
    def _ref_ce(pred, tgt):
        p = jnp.transpose(pred, (0, 2, 3, 1)).reshape(-1, C)
        t = tgt.reshape(-1)
        logp = jax.nn.log_softmax(p, axis=-1)
        valid = t != IGNORE_LABEL
        picked = jnp.take_along_axis(
            logp, jnp.clip(t, 0, C - 1)[:, None], axis=-1)[:, 0]
        return jnp.sum(jnp.where(valid, -picked, 0.0)) / jnp.sum(valid)

    ref = _ref_ce(main_pred, targets) + AUX_WEIGHT * _ref_ce(aux_pred, targets)
    assert jnp.allclose(loss, ref, rtol=1e-5, atol=1e-5), (loss, ref)

    print("KERNEL_OK")
</pallas_src>

<mosaic_0001>
module attributes {stable_mosaic.version = 11 : i64} {
  func.func @_psp_ce_kernel(%arg0: i32, %arg1: i32, %arg2: memref<1x2x128xi32, #tpu.memory_space<vmem>>, %arg3: memref<1x4x2x128xf32, #tpu.memory_space<vmem>>, %arg4: memref<1x4x2x128xf32, #tpu.memory_space<vmem>>, %arg5: memref<1x2x128xf32, #tpu.memory_space<vmem>>, %arg6: memref<1x2x128xf32, #tpu.memory_space<vmem>>, %arg7: memref<1x2x128xf32, #tpu.memory_space<vmem>>) attributes {dimension_semantics = [#tpu.dimension_semantics<parallel>, #tpu.dimension_semantics<arbitrary>], iteration_bounds = array<i64: 2, 1>, scalar_prefetch = 0 : i64, scratch_operands = 0 : i64, tpu.core_type = #tpu.core_type<tc>, window_params = [{transform_indices = @transform_0, window_bounds = array<i64: 1, 2, 128>}, {transform_indices = @transform_1, window_bounds = array<i64: 1, 4, 2, 128>}, {transform_indices = @transform_2, window_bounds = array<i64: 1, 4, 2, 128>}, {transform_indices = @transform_3, window_bounds = array<i64: 1, 2, 128>}, {transform_indices = @transform_4, window_bounds = array<i64: 1, 2, 128>}, {transform_indices = @transform_5, window_bounds = array<i64: 1, 2, 128>}]} {
    %c0_i32 = arith.constant 0 : i32
    %0 = arith.cmpi eq, %arg1, %c0_i32 : i32
    %1 = arith.extui %0 : i1 to i32
    %c0_i32_0 = arith.constant 0 : i32
    %2 = arith.cmpi ne, %1, %c0_i32_0 : i32
    scf.if %2 {
      %cst_39 = arith.constant 0.000000e+00 : f32
      %64 = vector.broadcast %cst_39 : f32 to vector<1x2x128xf32>
      %c0_40 = arith.constant 0 : index
      %c0_41 = arith.constant 0 : index
      %c0_42 = arith.constant 0 : index
      %65 = vector.load %arg5[%c0_40, %c0_41, %c0_42] : memref<1x2x128xf32, #tpu.memory_space<vmem>>, vector<1x2x128xf32>
      tpu.vector_store %arg5[%c0_40, %c0_41, %c0_42], %64 {strides = array<i32>} : memref<1x2x128xf32, #tpu.memory_space<vmem>>, vector<1x2x128xf32>,
      %cst_43 = arith.constant 0.000000e+00 : f32
      %66 = vector.broadcast %cst_43 : f32 to vector<1x2x128xf32>
      %c0_44 = arith.constant 0 : index
      %c0_45 = arith.constant 0 : index
      %c0_46 = arith.constant 0 : index
      %67 = vector.load %arg6[%c0_44, %c0_45, %c0_46] : memref<1x2x128xf32, #tpu.memory_space<vmem>>, vector<1x2x128xf32>
      tpu.vector_store %arg6[%c0_44, %c0_45, %c0_46], %66 {strides = array<i32>} : memref<1x2x128xf32, #tpu.memory_space<vmem>>, vector<1x2x128xf32>,
      %cst_47 = arith.constant 0.000000e+00 : f32
      %68 = vector.broadcast %cst_47 : f32 to vector<1x2x128xf32>
      %c0_48 = arith.constant 0 : index
      %c0_49 = arith.constant 0 : index
      %c0_50 = arith.constant 0 : index
      %69 = vector.load %arg7[%c0_48, %c0_49, %c0_50] : memref<1x2x128xf32, #tpu.memory_space<vmem>>, vector<1x2x128xf32>
      tpu.vector_store %arg7[%c0_48, %c0_49, %c0_50], %68 {strides = array<i32>} : memref<1x2x128xf32, #tpu.memory_space<vmem>>, vector<1x2x128xf32>,
    } else {
    }
    %c0 = arith.constant 0 : index
    %c0_1 = arith.constant 0 : index
    %c0_2 = arith.constant 0 : index
    %3 = vector.load %arg2[%c0, %c0_1, %c0_2] : memref<1x2x128xi32, #tpu.memory_space<vmem>>, vector<1x2x128xi32>
    %4 = vector.shape_cast %3 : vector<1x2x128xi32> to vector<2x128xi32>
    %5 = tpu.iota {dimensions = array<i32: 0>} : vector<2x128xi32>
    %c2_i32 = arith.constant 2 : i32
    %6 = arith.muli %arg1, %c2_i32 : i32
    %7 = vector.broadcast %6 : i32 to vector<2x128xi32>
    %8 = arith.addi %7, %5 : vector<2x128xi32>
    %c2_i32_3 = arith.constant 2 : i32
    %9 = vector.broadcast %c2_i32_3 : i32 to vector<2x128xi32>
    %10 = arith.cmpi slt, %8, %9 : vector<2x128xi32>
    %c255_i32 = arith.constant 255 : i32
    %11 = vector.broadcast %c255_i32 : i32 to vector<2x128xi32>
    %12 = arith.cmpi ne, %4, %11 : vector<2x128xi32>
    %13 = arith.andi %12, %10 : vector<2x128xi1>
    %c0_4 = arith.constant 0 : index
    %c0_5 = arith.constant 0 : index
    %c0_6 = arith.constant 0 : index
    %14 = vector.load %arg7[%c0_4, %c0_5, %c0_6] : memref<1x2x128xf32, #tpu.memory_space<vmem>>, vector<1x2x128xf32>
    %15 = arith.extui %13 : vector<2x128xi1> to vector<2x128xi32>
    %16 = arith.sitofp %15 : vector<2x128xi32> to vector<2x128xf32>
    %17 = vector.shape_cast %16 : vector<2x128xf32> to vector<1x2x128xf32>
    %18 = arith.addf %14, %17 : vector<1x2x128xf32>
    %c0_7 = arith.constant 0 : index
    %c0_8 = arith.constant 0 : index
    %c0_9 = arith.constant 0 : index
    %19 = vector.load %arg7[%c0_7, %c0_8, %c0_9] : memref<1x2x128xf32, #tpu.memory_space<vmem>>, vector<1x2x128xf32>
    tpu.vector_store %arg7[%c0_7, %c0_8, %c0_9], %18 {strides = array<i32>} : memref<1x2x128xf32, #tpu.memory_space<vmem>>, vector<1x2x128xf32>,
    %c0_10 = arith.constant 0 : index
    %c0_11 = arith.constant 0 : index
    %c0_12 = arith.constant 0 : index
    %c0_13 = arith.constant 0 : index
    %20 = vector.load %arg3[%c0_10, %c0_11, %c0_12, %c0_13] : memref<1x4x2x128xf32, #tpu.memory_space<vmem>>, vector<1x4x2x128xf32>
    %21 = vector.shape_cast %20 : vector<1x4x2x128xf32> to vector<4x2x128xf32>
    %22 = tpu.iota {dimensions = array<i32: 0>} : vector<4x2x128xi32>
    %23 = vector.shape_cast %4 : vector<2x128xi32> to vector<1x2x128xi32>
    %24 = vector.broadcast %23 : vector<1x2x128xi32> to vector<4x2x128xi32>
    %25 = arith.cmpi eq, %22, %24 : vector<4x2x128xi32>
    %cst = arith.constant dense<0xFF800000> : vector<2x128xf32>
    %26 = vector.multi_reduction <maximumf>, %21, %cst [0] : vector<4x2x128xf32> to vector<2x128xf32>
    %27 = vector.shape_cast %26 : vector<2x128xf32> to vector<1x2x128xf32>
    %28 = vector.broadcast %27 : vector<1x2x128xf32> to vector<4x2x128xf32>
    %29 = arith.subf %21, %28 : vector<4x2x128xf32>
    %30 = math.exp %29 : vector<4x2x128xf32>
    %cst_14 = arith.constant dense<0.000000e+00> : vector<2x128xf32>
    %31 = vector.multi_reduction <add>, %30, %cst_14 [0] : vector<4x2x128xf32> to vector<2x128xf32>
    %32 = math.log %31 : vector<2x128xf32>
    %33 = arith.addf %32, %26 : vector<2x128xf32>
    %cst_15 = arith.constant 0.000000e+00 : f32
    %34 = vector.broadcast %cst_15 : f32 to vector<4x2x128xf32>
    %35 = arith.select %25, %21, %34 : vector<4x2x128xi1>, vector<4x2x128xf32>
    %cst_16 = arith.constant dense<0.000000e+00> : vector<2x128xf32>
    %36 = vector.multi_reduction <add>, %35, %cst_16 [0] : vector<4x2x128xf32> to vector<2x128xf32>
    %37 = arith.subf %33, %36 : vector<2x128xf32>
    %cst_17 = arith.constant 0.000000e+00 : f32
    %38 = vector.broadcast %cst_17 : f32 to vector<2x128xf32>
    %39 = arith.select %13, %37, %38 : vector<2x128xi1>, vector<2x128xf32>
    %c0_18 = arith.constant 0 : index
    %c0_19 = arith.constant 0 : index
    %c0_20 = arith.constant 0 : index
    %40 = vector.load %arg5[%c0_18, %c0_19, %c0_20] : memref<1x2x128xf32, #tpu.memory_space<vmem>>, vector<1x2x128xf32>
    %41 = vector.shape_cast %39 : vector<2x128xf32> to vector<1x2x128xf32>
    %42 = arith.addf %40, %41 : vector<1x2x128xf32>
    %c0_21 = arith.constant 0 : index
    %c0_22 = arith.constant 0 : index
    %c0_23 = arith.constant 0 : index
    %43 = vector.load %arg5[%c0_21, %c0_22, %c0_23] : memref<1x2x128xf32, #tpu.memory_space<vmem>>, vector<1x2x128xf32>
    tpu.vector_store %arg5[%c0_21, %c0_22, %c0_23], %42 {strides = array<i32>} : memref<1x2x128xf32, #tpu.memory_space<vmem>>, vector<1x2x128xf32>,
    %c0_24 = arith.constant 0 : index
    %c0_25 = arith.constant 0 : index
    %c0_26 = arith.constant 0 : index
    %c0_27 = arith.constant 0 : index
    %44 = vector.load %arg4[%c0_24, %c0_25, %c0_26, %c0_27] : memref<1x4x2x128xf32, #tpu.memory_space<vmem>>, vector<1x4x2x128xf32>
    %45 = vector.shape_cast %44 : vector<1x4x2x128xf32> to vector<4x2x128xf32>
    %cst_28 = arith.constant dense<0xFF800000> : vector<2x128xf32>
    %46 = vector.multi_reduction <maximumf>, %45, %cst_28 [0] : vector<4x2x128xf32> to vector<2x128xf32>
    %47 = vector.shape_cast %46 : vector<2x128xf32> to vector<1x2x128xf32>
    %48 = vector.broadcast %47 : vector<1x2x128xf32> to vector<4x2x128xf32>
    %49 = arith.subf %45, %48 : vector<4x2x128xf32>
    %50 = math.exp %49 : vector<4x2x128xf32>
    %cst_29 = arith.constant dense<0.000000e+00> : vector<2x128xf32>
    %51 = vector.multi_reduction <add>, %50, %cst_29 [0] : vector<4x2x128xf32> to vector<2x128xf32>
    %52 = math.log %51 : vector<2x128xf32>
    %53 = arith.addf %52, %46 : vector<2x128xf32>
    %cst_30 = arith.constant 0.000000e+00 : f32
    %54 = vector.broadcast %cst_30 : f32 to vector<4x2x128xf32>
    %55 = arith.select %25, %45, %54 : vector<4x2x128xi1>, vector<4x2x128xf32>
    %cst_31 = arith.constant dense<0.000000e+00> : vector<2x128xf32>
    %56 = vector.multi_reduction <add>, %55, %cst_31 [0] : vector<4x2x128xf32> to vector<2x128xf32>
    %57 = arith.subf %53, %56 : vector<2x128xf32>
    %cst_32 = arith.constant 0.000000e+00 : f32
    %58 = vector.broadcast %cst_32 : f32 to vector<2x128xf32>
    %59 = arith.select %13, %57, %58 : vector<2x128xi1>, vector<2x128xf32>
    %c0_33 = arith.constant 0 : index
    %c0_34 = arith.constant 0 : index
    %c0_35 = arith.constant 0 : index
    %60 = vector.load %arg6[%c0_33, %c0_34, %c0_35] : memref<1x2x128xf32, #tpu.memory_space<vmem>>, vector<1x2x128xf32>
    %61 = vector.shape_cast %59 : vector<2x128xf32> to vector<1x2x128xf32>
    %62 = arith.addf %60, %61 : vector<1x2x128xf32>
    %c0_36 = arith.constant 0 : index
    %c0_37 = arith.constant 0 : index
    %c0_38 = arith.constant 0 : index
    %63 = vector.load %arg6[%c0_36, %c0_37, %c0_38] : memref<1x2x128xf32, #tpu.memory_space<vmem>>, vector<1x2x128xf32>
    tpu.vector_store %arg6[%c0_36, %c0_37, %c0_38], %62 {strides = array<i32>} : memref<1x2x128xf32, #tpu.memory_space<vmem>>, vector<1x2x128xf32>,
    return
  }
  func.func @transform_0(%arg0: i32, %arg1: i32) -> (i32, i32, i32) {
    %c0_i32 = arith.constant 0 : i32
    %c0_i32_0 = arith.constant 0 : i32
    return %arg0, %arg1, %c0_i32 : i32, i32, i32
  }
  func.func @transform_1(%arg0: i32, %arg1: i32) -> (i32, i32, i32, i32) {
    %c0_i32 = arith.constant 0 : i32
    %c0_i32_0 = arith.constant 0 : i32
    %c0_i32_1 = arith.constant 0 : i32
    return %arg0, %c0_i32, %arg1, %c0_i32_0 : i32, i32, i32, i32
  }
  func.func @transform_2(%arg0: i32, %arg1: i32) -> (i32, i32, i32, i32) {
    %c0_i32 = arith.constant 0 : i32
    %c0_i32_0 = arith.constant 0 : i32
    %c0_i32_1 = arith.constant 0 : i32
    return %arg0, %c0_i32, %arg1, %c0_i32_0 : i32, i32, i32, i32
  }
  func.func @transform_3(%arg0: i32, %arg1: i32) -> (i32, i32, i32) {
    %c0_i32 = arith.constant 0 : i32
    %c0_i32_0 = arith.constant 0 : i32
    %c0_i32_1 = arith.constant 0 : i32
    return %arg0, %c0_i32, %c0_i32_0 : i32, i32, i32
  }
  func.func @transform_4(%arg0: i32, %arg1: i32) -> (i32, i32, i32) {
    %c0_i32 = arith.constant 0 : i32
    %c0_i32_0 = arith.constant 0 : i32
    %c0_i32_1 = arith.constant 0 : i32
    return %arg0, %c0_i32, %c0_i32_0 : i32, i32, i32
  }
  func.func @transform_5(%arg0: i32, %arg1: i32) -> (i32, i32, i32) {
    %c0_i32 = arith.constant 0 : i32
    %c0_i32_0 = arith.constant 0 : i32
    %c0_i32_1 = arith.constant 0 : i32
    return %arg0, %c0_i32, %c0_i32_0 : i32, i32, i32
  }
}

</mosaic_0001>

<bundles_post_ra>
// kernel: tpu_custom_call.1
= control target key start
LH: loop header
LB: loop body
LE: loop exit
PB: predicated region body
PF: predicated region fallthrough
CT: control target
= control target key end

     0   :  { %s1470_s0 = inlined_call_operand.hbm [shape: s32[2,2,128], index: 0, kind: input, shape index: {}]   ;;  %s1471_s1 = inlined_call_operand.hbm [shape: f32[2,4,2,128], index: 1, kind: input, shape index: {}]   ;;  %s1472_s2 = inlined_call_operand.hbm [shape: f32[2,4,2,128], index: 2, kind: input, shape index: {}]   ;;  %s1473_s3 = inlined_call_operand.hbm [shape: f32[2,2,128], index: 3, kind: output, shape index: {0}]   ;;  %s1474_s4 = inlined_call_operand.hbm [shape: f32[2,2,128], index: 4, kind: output, shape index: {1}]   ;;  %s1475_s5 = inlined_call_operand.hbm [shape: f32[2,2,128], index: 5, kind: output, shape index: {2}]  }
   0x1   :  { %1481 = sst [smem:[#allocation21_spill]] %s1471_s1 }
   0x2   :  { %11 = vsyncpa [#allocation3], 0 }
   0x3   :  { %13 = vsyncpa [#allocation3 + $0x1], 0 }
   0x4   :  { %14 = vsyncpa [#allocation6], 0 }
   0x5   :  { %16 = vsyncpa [#allocation6 + $0x1], 0 }
   0x6   :  { %17 = vsyncpa [#allocation4], 0 }
   0x7   :  { %19 = vsyncpa [#allocation4 + $0x1], 0 }
   0x8   :  { %20 = vsyncpa [#allocation10], 0 }
   0x9   :  { %22 = vsyncpa [#allocation10 + $0x1], 0  ;;  %s1135_s18 = smov 0   ;;  %s1137_s19 = smov 0  }
   0xa   :  { %s1139_s20 = smov 0   ;;  %s1141_s21 = smov 0  }
   0xb   :  { %s1143_s22 = smov 0   ;;  %s1145_s23 = smov 0  }
   0xc LB: > { %1482 = sst [smem:[#allocation16_spill]] %s1080_s18  ;;  %s1166_s24 = sadd.s32 4294967295, %s1100_s23   ;;  %s1100_s23 = sphi %s1145_s23, %s28_s23   ;;  %s1096_s22 = sphi %s1143_s22, %s1504_s22   ;;  %s1092_s21 = sphi %s1141_s21, %s1503_s21   ;;  %s1088_s20 = sphi %s1139_s20, %s1499_s20   ;;  %s1084_s19 = sphi %s1137_s19, %s1502_s19   ;;  %s1080_s18 = sphi %s1135_s18, %s1501_s18  }
   0xd   : > { %1483 = sst [smem:[#allocation17_spill]] %s1088_s20  ;;  %s1476_s25 = sadd.s32 4294967294, %s1100_s23  }
   0xe   : > { %s40_s26 = sadd.s32 1, %s1096_s22  ;;  %s49_s27 = sadd.s32 1, %s1088_s20 }
   0xf   : > { %p42_p0 = scmp.ge.s32.totalorder %s40_s26, 2  ;;  %p56_p1 = scmp.ne.s32.totalorder %s1088_s20, %s1084_s19 }
  0x10   : > { %p57_p2 = scmp.eq.s32.totalorder %s1100_s23, 0  ;;  %p62_p3 = scmp.ne.s32.totalorder %s1084_s19, %s1080_s18 }
  0x11   : > { %s1506_s26 = smov (%p42_p0, %s40_s26), 0  ;;  %p63_p5 = scmp.eq.s32.totalorder %s1166_s24, 0 }
  0x12   : > { %1484 = sst [smem:[#allocation18_spill]] %s1506_s26  ;;  %p1178_p4 = por %p57_p2, %p56_p1 }
  0x13   : > { %s44_s29 = ssub.s32 %s1096_s22, %s1506_s26  ;;  %p142_p6 = scmp.eq.s32.totalorder %s1166_s24, 1 }
  0x14   : > { %p47_p7 = scmp.eq.s32.totalorder %s44_s29, 0  ;;  %p1186_p8 = por %p63_p5, %p62_p3 }
  0x15   : > { %p1190_p9 = por %p142_p6, %p56_p1  ;;  %p148_p10 = scmp.eq.s32.totalorder %s1476_s25, 1 }
  0x16   : > { %s1197_s7 = scalar_select %p47_p7, %s1088_s20, %s49_s27  }
  0x17   : > { %p1199_p11 = por %p148_p10, %p62_p3  ;;  %p732_p12 = scmp.ge.s32.totalorder %s1100_s23, 2 }
  0x18   : > { %1488 = sst [smem:[#allocation19_spill]] %s1197_s7  ;;  %p791_p13 = scmp.lt.s32.totalorder %s1100_s23, 2 }
  0x19   : > { %s1489_s8 = scalar_select %p1199_p11, 1, 0 }
  0x1a   : > { %s1206_s9 = sand.u32 1, %s1088_s20   ;;  %s240_s10 = sand.u32 1, %s1100_s23  }
  0x1b   : > { %1490 = sst [smem:[#allocation20_spill]] %s1489_s8  ;;  %s735_s11 = sshll.u32 %s1206_s9, 3 }
  0x1c   : > { %p1212_p0 = pnand %p791_p13, %p1178_p4  ;;  %s757_s13 = sshll.u32 %s1096_s22, 3 }
  0x1d   : > { %s1492_s1 = sld [smem:[#allocation21_spill]]  ;;  %s244_s27 = scalar_lea.vmem [#allocation5], %s735_s11 }
  0x1e   : > { %s253_s29 = sshll.u32 %s244_s27, 4  ;;  %s241_s28 = scalar_lea.sflag [#allocation6], %s240_s10  ;;  %s254_s29 = int_to_ptr.vmem [resolvable:$true] %s253_s29 }
  0x1f   : > { %s1102_s25 = smov 32   ;;  %s1103_s26 = smov 2  }
  0x20   : > { %s273_s8 = scalar_lea.hbm %s1472_s2, %s757_s13  ;;  %s267_s15 = scalar_lea.vmem [#allocation7], %s735_s11 }
  0x21   : > { %s274_s14 = sshll.u32 %s273_s8, 4  ;;  %p741_p1 = scmp.ge.s32.totalorder %s1100_s23, 1  ;;  %s275_s14 = int_to_ptr.hbm [resolvable:$true] %s274_s14 }
  0x22   : > { %p284_p2 = scmp.lt.s32.totalorder %s1100_s23, 3  ;;  %s733_s10 = sshll.u32 %s1206_s9, 1 }
  0x23   : > { %s250_s16 = scalar_lea.hbm %s1492_s1, %s757_s13  ;;  %s734_s27 = sshll.u32 %s1096_s22, 1 }
  0x24   : > { %s251_s17 = sshll.u32 %s250_s16, 4  ;;  %s276_s16 = sshll.u32 %s267_s15, 4  ;;  %s252_s17 = int_to_ptr.hbm [resolvable:$true] %s251_s17  ;;  %s277_s16 = int_to_ptr.vmem [resolvable:$true] %s276_s16 }
  0x25   : > { %777 = dma.hbm_to_vmem [thread:$0]  (!%p1212_p0), %s252_s17, 128, %s254_s29, %s241_s28, %s1102_s25, %s1102_s25, %s1103_s26  }
  0x26   : > { %p285_p3 = pnand %p741_p1, %p284_p2  ;;  %s229_s17 = scalar_lea.hbm %s1470_s0, %s734_s27 }
  0x27   : > { %s231_s29 = sshll.u32 %s229_s17, 4  ;;  %s224_s20 = scalar_lea.vmem [#allocation2], %s733_s10  ;;  %s232_s29 = int_to_ptr.hbm [resolvable:$true] %s231_s29 }
  0x28   : > { %s233_s7 = sshll.u32 %s224_s20, 4  ;;  %s221_s8 = scalar_lea.sflag [#allocation3], %s1206_s9  ;;  %s234_s7 = int_to_ptr.vmem [resolvable:$true] %s233_s7 }
  0x29   : > { %774 = dma.hbm_to_vmem [thread:$0]  (!%p1212_p0), %s232_s29, 32, %s234_s7, %s221_s8  }
  0x2a   : > { %780 = dma.hbm_to_vmem [thread:$0]  (!%p1212_p0), %s275_s14, 128, %s277_s16, %s241_s28, %s1102_s25, %s1102_s25, %s1103_s26  }
  0x2b   : > { %288 = sbr.rel (%p285_p3) target bundleno = 124 (0x7c), region = 32  ;;  %s1238_s11 = sand.u32 (!%p285_p3), 1, %s1084_s19  }
  0x2c   : > { %s742_s13 = sshll.u32 (!%p285_p3), %s1238_s11, 1  ;;  %s291_s1 = scalar_lea.sflag (!%p285_p3), [#allocation3], %s1238_s11 }
  0x2d   : > { %s294_s18 = scalar_lea.vmem (!%p285_p3), [#allocation2], %s742_s13 }
  0x30   : > { %1063 = dma.done.wait (%p1186_p8), %s291_s1, 32  }
  0x31   : > { %1065 = vsyncadd (%p1186_p8), %s291_s1, 4294967264  ;;  %s300_s25 = sand.u32 1, %s1166_s24   ;;  %s743_s26 = sshll.u32 %s1238_s11, 3 }
  0x32   : > { %s301_s9 = scalar_lea.sflag [#allocation6], %s300_s25  ;;  %s1250_s12 = scalar_lea.vmem [#allocation5], %s743_s26 }
  0x33   : > { %1067 = dma.done.wait (%p1186_p8), %s301_s9, 256  }
  0x34   : > { %1069 = vsyncadd (%p1186_p8), %s301_s9, 4294967040  ;;  %v370_v0 = vlaneseq  ;;  %s1256_s28 = scalar_lea.vmem [#allocation9], %s742_s13  ;;  %v1104_v1 = vmov 0.0   ;;  %s1259_s14 = scalar_lea.vmem [#allocation8], %s742_s13  ;;  %vm391_vm0 = vcmask 1041408  }
  0x35   : > { %367 = vst [vmem:[%s1256_s28] sm:$0x3] %v1104_v1  ;;  %s1262_s15 = scalar_lea.vmem [#allocation11], %s742_s13  ;;  %v1265_v3 = vld [vmem:[%s294_s18] sm:$0x3]  ;;  %s314_s30 = scalar_lea.vmem [#allocation7], %s743_s26 }
  0x36   : > { %366 = vst [vmem:[%s1259_s14] sm:$0x3] %v1104_v1  ;;  %v371_v2 = vshrl.u32 %v370_v0, 7  ;;  %v437_v4 = vld [vmem:[%s314_s30] sm:$0x3]  ;;  %v438_v5 = vld [vmem:[%s314_s30 + $0x2] sm:$0x3] }
  0x37   : > { %368 = vst [vmem:[%s1262_s15] sm:$0x3] %v1104_v1  ;;  %vm376_vm2 = vcmp.ne.s32.totalorder %v1265_v3, 255  ;;  %v1268_v6 = vld [vmem:[%s314_s30 + $0x4] sm:$0x3]  ;;  %v1270_v7 = vld [vmem:[%s314_s30 + $0x6] sm:$0x3] }
  0x38   : > { %vm375_vm1 = vcmp.lt.s32.totalorder %v371_v2, 2  ;;  %v441_v8 = vsel %vm391_vm0, %v437_v4, -inf  ;;  %v442_v9 = vsel %vm391_vm0, %v438_v5, -inf  ;;  %v443_v10 = vsel %vm391_vm0, %v1268_v6, -inf  ;;  %v1279_v13 = vld [vmem:[%s1250_s12] sm:$0x3] }
  0x39   : > { %v444_v11 = vsel %vm391_vm0, %v1270_v7, -inf  ;;  %v445_v12 = vmax.f32 %v441_v8, %v442_v9  ;;  %vm1281_vm3 = vmand %vm376_vm2, %vm375_vm1  ;;  %v1286_v16 = vld [vmem:[%s1250_s12 + $0x2] sm:$0x3]  ;;  %v1289_v17 = vld [vmem:[%s1250_s12 + $0x4] sm:$0x3]  ;;  %v392_v20 = vsel %vm391_vm0, %v1279_v13, -inf }
  0x3a   : > { %v446_v15 = vmax.f32 %v443_v10, %v444_v11  ;;  %v1294_v19 = vld [vmem:[%s1250_s12 + $0x6] sm:$0x3]  ;;  %v393_v21 = vsel %vm391_vm0, %v1286_v16, -inf  ;;  %v748_v22 = vsel %vm1281_vm3, 1.0, %v1104_v1  ;;  %v394_v23 = vsel %vm391_vm0, %v1289_v17, -inf  ;;  %s1363_s16 = sshll.u32 %s1092_s21, 1 }
  0x3b   : > { %v395_v24 = vsel %vm391_vm0, %v1294_v19, -inf  ;;  %v396_v25 = vmax.f32 %v392_v20, %v393_v21  ;;  %vm387_vm4 = vcmp.eq.s32.totalorder %v1265_v3, 0  ;;  %vm388_vm5 = vcmp.eq.s32.totalorder %v1265_v3, 1  ;;  %s521_s17 = scalar_lea.hbm %s1474_s4, %s1363_s16  ;;  %s535_s20 = scalar_lea.hbm %s1475_s5, %s1363_s16 }
  0x3c   : > { %v1291_v18 = vmax.f32 %v445_v12, %v446_v15  ;;  %v397_v31 = vmax.f32 %v394_v23, %v395_v24  ;;  %v470_v51 = vsel %vm387_vm4, %v437_v4, 0.0  ;;  %v471_v52 = vsel %vm388_vm5, %v438_v5, 0.0  ;;  %s537_s7 = sshll.u32 %s1262_s15, 4  ;;  %s523_s8 = sshll.u32 %s1256_s28, 4  ;;  %s1385_s7 = int_to_ptr.vmem [resolvable:$true] %s537_s7  ;;  %s524_s8 = int_to_ptr.vmem [resolvable:$true] %s523_s8 }
  0x3d   : > { %vm389_vm6 = vcmp.eq.s32.totalorder %v1265_v3, 2  ;;  %v474_v59 = vsel %vm391_vm0, %v470_v51, 0.0  ;;  %v475_v60 = vsel %vm391_vm0, %v471_v52, 0.0  ;;  %vm390_vm7 = vcmp.eq.s32.totalorder %v1265_v3, 3  ;;  %s1381_s13 = sshll.u32 %s521_s17, 4  ;;  %s1383_s1 = sshll.u32 %s535_s20, 4  ;;  %s526_s13 = int_to_ptr.hbm [resolvable:$true] %s1381_s13  ;;  %s540_s1 = int_to_ptr.hbm [resolvable:$true] %s1383_s1 }
  0x3e   : > { %v448_v26 = vsub.f32 %v437_v4, %v1291_v18  ;;  %v449_v27 = vsub.f32 %v438_v5, %v1291_v18  ;;  %v450_v28 = vsub.f32 %v1268_v6, %v1291_v18  ;;  %v451_v29 = vsub.f32 %v1270_v7, %v1291_v18  ;;  %v378_v30 = vld [vmem:[%s1262_s15] sm:$0x3]  ;;  %s507_s9 = scalar_lea.hbm %s1473_s3, %s1363_s16  ;;  %s509_s12 = sshll.u32 %s1259_s14, 4  ;;  %s510_s12 = int_to_ptr.vmem [resolvable:$true] %s509_s12 }
  0x3f   : > { %v381_v35 = vadd.f32 %v748_v22, %v378_v30  ;;  %v1313_v37 = vmax.f32 %v396_v25, %v397_v31  ;;  %v472_v62 = vsel %vm389_vm6, %v1268_v6, 0.0  ;;  %v421_v4 = vsel %vm387_vm4, %v1279_v13, 0.0  ;;  %s492_s30 = scalar_lea.sflag [#allocation10], %s300_s25  ;;  %s968_s10 = sshra.s32 %s526_s13, 4  ;;  %s969_s10 = int_to_ptr.hbm [resolvable:$true] %s968_s10 }
  0x40   : > { %v452_v32 = vmul.f32 1.442695, %v448_v26  ;;  %v454_v33 = vmul.f32 1.442695, %v449_v27  ;;  %v456_v34 = vmul.f32 1.442695, %v450_v28  ;;  %v476_v9 = vadd.f32 %v475_v60, %v474_v59  ;;  %p975_p7 = scmp.lt.s32.totalorder %s969_s10, %s1474_s4 }
  0x41   : > { %v458_v36 = vmul.f32 1.442695, %v451_v29  ;;  %382 = vst [vmem:[%s1262_s15] sm:$0x3] %v381_v35  ;;  %v399_v38 = vsub.f32 %v1279_v13, %v1313_v37  ;;  %v400_v39 = vsub.f32 %v1286_v16, %v1313_v37  ;;  %v401_v40 = vsub.f32 %v1289_v17, %v1313_v37  ;;  %s1399_s15 = sshll.u32 %s507_s9, 4  ;;  %s970_s27 = scalar_lea.hbm %s969_s10, 2  ;;  %s512_s15 = int_to_ptr.hbm [resolvable:$true] %s1399_s15 }
  0x42   : > { %844 = vpow2.f32 %v452_v32  ;;  %v402_v41 = vsub.f32 %v1294_v19, %v1313_v37  ;;  %v422_v5 = vsel %vm388_vm5, %v1286_v16, 0.0  ;;  %v477_v11 = vsel %vm391_vm0, %v472_v62, 0.0  ;;  %p971_p4 = scmp.ne.s32.totalorder %s969_s10, %s970_s27  ;;  %s974_s21 = scalar_lea.hbm %s1474_s4, 4 }
  0x43   : > { %846 = vpow2.f32 %v454_v33  ;;  %v403_v42 = vmul.f32 1.442695, %v399_v38  ;;  %v405_v43 = vmul.f32 1.442695, %v400_v39  ;;  %v407_v44 = vmul.f32 1.442695, %v401_v40  ;;  %p976_p8 = scmp.lt.s32.totalorder %s974_s21, %s970_s27 }
  0x44   : > { %848 = vpow2.f32 %v456_v34  ;;  %v409_v45 = vmul.f32 1.442695, %v402_v41  ;;  %v473_v15 = vsel %vm390_vm7, %v1270_v7, 0.0  ;;  %v425_v20 = vsel %vm391_vm0, %v421_v4, 0.0  ;;  %v434_v39 = vld [vmem:[%s1259_s14] sm:$0x3]  ;;  %p972_p5 = pnand %p971_p4, %p1190_p9 }
  0x45   : > { %850 = vpow2.f32 %v458_v36  ;;  %v426_v16 = vsel %vm391_vm0, %v422_v5, 0.0  ;;  %v423_v21 = vsel %vm389_vm6, %v1289_v17, 0.0  ;;  %v478_v22 = vadd.f32 %v477_v11, %v476_v9  ;;  %p977_p10 = por %p976_p8, %p975_p7 }
  0x46   : > { %852 = vpow2.f32 %v403_v42  ;;  %v479_v24 = vsel %vm391_vm0, %v473_v15, 0.0  ;;  %v427_v25 = vadd.f32 %v426_v16, %v425_v20  ;;  %v428_v7 = vsel %vm391_vm0, %v423_v21, 0.0  ;;  %p973_p6 = pneg %p972_p5 }
  0x47   : > { %854 = vpow2.f32 %v405_v43  ;;  %v424_v17 = vsel %vm390_vm7, %v1294_v19, 0.0  ;;  %v480_v28 = vadd.f32 %v479_v24, %v478_v22  ;;  %v483_v19 = vld [vmem:[%s1256_s28] sm:$0x3] }
  0x48   : > { %v845_v46 = vpop.eup %844  ;;  %856 = vpow2.f32 %v407_v44  ;;  %v429_v29 = vadd.f32 %v428_v7, %v427_v25  ;;  %v430_v31 = vsel %vm391_vm0, %v424_v17, 0.0  ;;  %p978_p13 = pnand %p977_p10, %p973_p6 }
  0x49   : > { %v847_v47 = vpop.eup %846  ;;  %v460_v48 = vsel %vm391_vm0, %v845_v46, 0.0  ;;  %858 = vpow2.f32 %v409_v45 }
  0x4a   : > { %v849_v49 = vpop.eup %848  ;;  %v461_v50 = vsel %vm391_vm0, %v847_v47, 0.0 }
  0x4b   : > { %v851_v53 = vpop.eup %850  ;;  %v462_v54 = vadd.f32 %v461_v50, %v460_v48  ;;  %v463_v55 = vsel %vm391_vm0, %v849_v49, 0.0 }
  0x4c   : > { %v465_v56 = vsel %vm391_vm0, %v851_v53, 0.0  ;;  %v853_v57 = vpop.eup %852 }
  0x4d   : > { %v464_v58 = vadd.f32 %v463_v55, %v462_v54  ;;  %v855_v61 = vpop.eup %854  ;;  %v411_v63 = vsel %vm391_vm0, %v853_v57, 0.0 }
  0x4e   : > { %v857_v0 = vpop.eup %856  ;;  %v412_v2 = vsel %vm391_vm0, %v855_v61, 0.0 }
  0x4f   : > { %v466_v1 = vadd.f32 %v465_v56, %v464_v58  ;;  %v859_v8 = vpop.eup %858  ;;  %v413_v10 = vadd.f32 %v412_v2, %v411_v63  ;;  %v414_v6 = vsel %vm391_vm0, %v857_v0, 0.0 }
  0x50   : > { %v416_v12 = vsel %vm391_vm0, %v859_v8, 0.0 }
  0x51   : > { %860 = vlog2.f32 %v466_v1  ;;  %v415_v13 = vadd.f32 %v414_v6, %v413_v10 }
  0x53   : > { %v417_v23 = vadd.f32 %v416_v12, %v415_v13 }
  0x55   : > { %862 = vlog2.f32 %v417_v23 }
  0x57   : > { %v861_v26 = vpop.eup %860 }
  0x58   : > { %v468_v27 = vmul.f32 0.6931472, %v861_v26 }
  0x5a   : > { %v469_v30 = vadd.f32 %v468_v27, %v1291_v18  ;;  %v431_v18 = vadd.f32 %v430_v31, %v429_v29 }
  0x5b   : > { %v863_v32 = vpop.eup %862 }
  0x5c   : > { %v481_v3 = vsub.f32 %v469_v30, %v480_v28  ;;  %v419_v33 = vmul.f32 0.6931472, %v863_v32 }
  0x5e   : > { %v482_v34 = vsel %vm1281_vm3, %v481_v3, 0.0  ;;  %v420_v36 = vadd.f32 %v419_v33, %v1313_v37 }
  0x5f   : > { %v484_v35 = vadd.f32 %v483_v19, %v482_v34 }
  0x60   : > { %v432_v38 = vsub.f32 %v420_v36, %v431_v18 }
  0x61   : > { %485 = vst [vmem:[%s1256_s28] sm:$0x3] %v484_v35 }
  0x62   : > { %981 = shalt.err (!%p978_p13)
}
  0x63   : > { %766 = dma.vmem_to_hbm [thread:$0]  (%p1190_p9), %s524_s8, 32, %s526_s13, %s492_s30   ;;  %v433_v37 = vsel %vm1281_vm3, %v432_v38, 0.0 }
  0x64   : > { %s996_s24 = sshra.s32 %s540_s1, 4  ;;  %s1002_s26 = scalar_lea.hbm %s1475_s5, 4  ;;  %s997_s24 = int_to_ptr.hbm [resolvable:$true] %s996_s24 }
  0x65   : > { %s998_s25 = scalar_lea.hbm %s997_s24, 2  ;;  %p1003_p3 = scmp.lt.s32.totalorder %s997_s24, %s1475_s5 }
  0x66   : > { %p999_p0 = scmp.ne.s32.totalorder %s997_s24, %s998_s25  ;;  %p1004_p4 = scmp.lt.s32.totalorder %s1002_s26, %s998_s25 }
  0x68   : > { %p1000_p1 = pnand %p999_p0, %p1190_p9  ;;  %p1005_p5 = por %p1004_p4, %p1003_p3 }
  0x6a   : > { %p1001_p2 = pneg %p1000_p1 }
  0x6c   : > { %p1006_p6 = pnand %p1005_p5, %p1001_p2 }
  0x6e   : > { %1009 = shalt.err (!%p1006_p6)
}
  0x6f   : > { %767 = dma.vmem_to_hbm [thread:$0]  (%p1190_p9), %s1385_s7, 32, %s540_s1, %s492_s30   ;;  %v435_v14 = vadd.f32 %v434_v39, %v433_v37 }
  0x70   : > { %s487_s8 = scalar_lea.sflag [#allocation4], %s1238_s11  ;;  %s1024_s13 = sshra.s32 %s512_s15, 4  ;;  %s1025_s13 = int_to_ptr.hbm [resolvable:$true] %s1024_s13 }
  0x71   : > { %436 = vst [vmem:[%s1259_s14] sm:$0x3] %v435_v14  ;;  %s1026_s27 = scalar_lea.hbm %s1025_s13, 2  ;;  %s1030_s21 = scalar_lea.hbm %s1473_s3, 4 }
  0x72   : > { %p1027_p7 = scmp.ne.s32.totalorder %s1025_s13, %s1026_s27  ;;  %p1031_p13 = scmp.lt.s32.totalorder %s1025_s13, %s1473_s3 }
  0x73   : > { %p1032_p0 = scmp.lt.s32.totalorder %s1030_s21, %s1026_s27 }
  0x74   : > { %p1028_p8 = pnand %p1027_p7, %p1190_p9 }
  0x75   : > { %p1033_p1 = por %p1032_p0, %p1031_p13 }
  0x76   : > { %p1029_p10 = pneg %p1028_p8 }
  0x78   : > { %p1034_p2 = pnand %p1033_p1, %p1029_p10 }
  0x7a   : > { %1037 = shalt.err (!%p1034_p2)
}
  0x7b   : > { %765 = dma.vmem_to_hbm [thread:$0]  (%p1190_p9), %s510_s12, 32, %s512_s15, %s487_s8  }
  0x7c PF: > { %s1495_s11 = sld [smem:[#allocation16_spill]]  ;;  %p782_p3 = pnand %p732_p12, %p1199_p11 }
  0x7e   : > { %p783_p4 = pneg %p782_p3 }
  0x82   : > { %s551_s7 = sand.u32 1, %s1495_s11  }
  0x83   : > { %s552_s1 = scalar_lea.sflag [#allocation4], %s551_s7 }
  0x84   : > { %1071 = dma.done.wait (%p783_p4), %s552_s1, 32  }
  0x85   : > { %1073 = vsyncadd (%p783_p4), %s552_s1, 4294967264  ;;  %s1497_s30 = sadd.s32 4294967294, %s1100_s23  }
  0x86   : > { %s561_s24 = sand.u32 1, %s1497_s30  }
  0x87   : > { %s562_s25 = scalar_lea.sflag [#allocation10], %s561_s24 }
  0x88   : > { %1075 = dma.done.wait (%p783_p4), %s562_s25, 64  }
  0x89   : > { %1077 = vsyncadd (%p783_p4), %s562_s25, 4294967232  ;;  %s28_s23 = sadd.s32 1, %s1100_s23   ;;  %s1498_s6 = sld [smem:[#allocation17_spill]] }
  0x8a   : > { %p25_p9 = scmp.ge.s32.totalorder %s28_s23, 4   ;;  %s1499_s20 = sld [smem:[#allocation19_spill]] }
  0x8b   : > { %s1500_s12 = sld [smem:[#allocation18_spill]]  ;;  %s1501_s18 = smov %s1084_s19 }
  0x8c   : > { %s1503_s21 = smov %s1096_s22 }
  0x8d   :  { %27 = sbr.rel (!%p25_p9) target bundleno = 12 (0xc), region = 137 }
  0x8f   : > { %s1502_s19 = smov %s1498_s6 }
  0x91   : > { %s1504_s22 = smov %s1500_s12 }
  0x92   :  { %578 = vsyncpa [#allocation3], 1 }
  0x93   :  { %580 = vsyncpa [#allocation3 + $0x1], 1 }
  0x94   :  { %581 = vsyncpa [#allocation6], 1 }
  0x95   :  { %583 = vsyncpa [#allocation6 + $0x1], 1 }
  0x96   :  { %584 = vsyncpa [#allocation4], 1 }
  0x97   :  { %586 = vsyncpa [#allocation4 + $0x1], 1 }
  0x98   :  { %587 = vsyncpa [#allocation10], 1 }
  0x99   :  { %589 = vsyncpa [#allocation10 + $0x1], 1 }

</bundles_post_ra>
